<compile_context>
chip_gen: v5e
topology: v5e:2x2
jax: 0.10.0
libtpu: 0.0.40
codegen_flags: <defaults>
</compile_context>

<pallas_src>
import functools

import jax
import jax.numpy as jnp
import numpy as np
from jax.experimental import pallas as pl
from jax.experimental.pallas import tpu as pltpu

IMG_HEIGHT = 28
IMG_WIDTH = 28
CHANNELS = 1
CLASSES = 10

LANE = 128      # TPU lane width: output feature dim is padded to this for dense stores
SUBLANE = 8     # TPU sublane width: M tiles must be a multiple of this
N_PAD = LANE    # padded output feature dim (CLASSES=10 -> 128)


def _round_up(x, m):
    return (x + m - 1) // m * m


# ----------------------------- Pallas kernel -----------------------------

def _linear_kernel(x_ref, w_ref, b_ref, o_ref):
    """o = x @ w + b for one (TILE_M, K) row tile; f32 MXU accumulation."""
    acc = jnp.dot(x_ref[...], w_ref[...], preferred_element_type=jnp.float32)
    o_ref[...] = (acc + b_ref[...]).astype(o_ref.dtype)


def linear_logits_padded(x2d, w_padded, b_padded, *, tile_m=1024):
    """x2d: (M, K) f32, w_padded: (K, 128) f32, b_padded: (1, 128) f32.

    Returns lane-padded logits of shape (round_up(M, 8), 128); the caller slices
    off the padded rows/columns (or consumes them padded).
    """
    m, k = x2d.shape
    kw, n_pad = w_padded.shape
    assert k == kw and n_pad == N_PAD and b_padded.shape == (1, N_PAD)

    # Pad rows only up to the next sublane multiple (<= 7 rows); skip entirely
    # when M already divides 8, so no extra HBM pass over the activations.
    m8 = _round_up(m, SUBLANE)
    if m8 != m:
        x2d = jnp.pad(x2d, ((0, m8 - m), (0, 0)))

    # Row tile: multiple of 8, at most tile_m, and at most ceil(M/2) so the grid
    # has >= 2 steps whenever possible (lets v7x shard row tiles across its 2 TCs).
    tm = min(tile_m, _round_up(pl.cdiv(m8, 2), SUBLANE))
    grid = (pl.cdiv(m8, tm),)   # ragged last block handled by Pallas (writes clipped)

    cost = pl.CostEstimate(
        flops=2 * m8 * k * N_PAD,
        transcendentals=0,
        bytes_accessed=4 * (m8 * k + k * N_PAD + N_PAD + m8 * N_PAD),
    )

    # Double-buffered x + out tiles, resident (double-buffered) weight + bias.
    vmem_est = 4 * (2 * tm * k + 2 * k * N_PAD + 2 * N_PAD + 2 * tm * N_PAD)
    vmem_limit = int(max(vmem_est + (4 << 20), 32 << 20))  # covers v5e's 16 MiB default

    out = pl.pallas_call(
        _linear_kernel,
        out_shape=jax.ShapeDtypeStruct((m8, N_PAD), jnp.float32),
        grid=grid,
        in_specs=[
            pl.BlockSpec((tm, k), lambda i: (i, 0)),        # row tile of activations
            pl.BlockSpec((k, N_PAD), lambda i: (0, 0)),     # full padded weight, resident
            pl.BlockSpec((1, N_PAD), lambda i: (0, 0)),     # bias row, resident
        ],
        out_specs=pl.BlockSpec((tm, N_PAD), lambda i: (i, 0)),
        compiler_params=pltpu.CompilerParams(
            dimension_semantics=("parallel",),              # shard row tiles across TCs (v7x)
            vmem_limit_bytes=vmem_limit,
        ),
        cost_estimate=cost,
    )(x2d, w_padded, b_padded)

    return out


# ----------------------------- model wrapper -----------------------------

def init_params(key):
    """PyTorch nn.Linear-style init: U(-1/sqrt(fan_in), 1/sqrt(fan_in))."""
    in_features = IMG_HEIGHT * IMG_WIDTH * CHANNELS
    kw, kb = jax.random.split(key)
    bound = 1.0 / np.sqrt(float(in_features))
    w = jax.random.uniform(kw, (in_features, CLASSES), jnp.float32, -bound, bound)
    b = jax.random.uniform(kb, (CLASSES,), jnp.float32, -bound, bound)
    return dict(w=w, b=b)


def prepare_params(params):
    """One-time prep: lane-pad weight/bias to 128 output lanes (hoisted out of the
    per-call path so no per-forward pad ops / extra HBM round trips)."""
    w_p = jnp.pad(params["w"], ((0, 0), (0, N_PAD - CLASSES)))
    b_p = jnp.pad(params["b"], (0, N_PAD - CLASSES)).reshape(1, N_PAD)
    return dict(w_padded=w_p, b_padded=b_p)


@functools.partial(jax.jit, static_argnames=())
def logreg_forward(x, prepared):
    """x: (N, C, H, W) (or any (N, ...)) -> (N, CLASSES) logits. Flatten + Linear."""
    n = x.shape[0]
    x2d = x.reshape(n, -1).astype(jnp.float32)                       # nn.Flatten()
    out = linear_logits_padded(x2d, prepared["w_padded"], prepared["b_padded"])
    # Consumers that tolerate lane-padded logits can use `out[:n]` directly and
    # defer/fuse the column slice; here we return the module's exact shape.
    return out[:n, :CLASSES]                                         # nn.Linear logits


@jax.jit
def logreg_forward_ref(x, params):
    """Pure-JAX reference for the correctness check."""
    x2d = x.reshape(x.shape[0], -1).astype(jnp.float32)
    return x2d @ params["w"] + params["b"]


if __name__ == "__main__":
    key = jax.random.PRNGKey(0)
    pkey, xkey = jax.random.split(key)
    params = init_params(pkey)
    prepared = prepare_params(params)

    # MNIST-like input implied by the module: (N, 1, 28, 28), NCHW like PyTorch.
    x = jax.random.normal(xkey, (2, CHANNELS, IMG_HEIGHT, IMG_WIDTH), jnp.float32)

    logits = logreg_forward(x, prepared)
    jax.block_until_ready(logits)
    assert logits.shape == (2, CLASSES)

    ref = logreg_forward_ref(x, params)
    np.testing.assert_allclose(np.asarray(logits), np.asarray(ref), rtol=1e-5, atol=1e-5)

    print("KERNEL_OK")
</pallas_src>

<mosaic_0001>
module attributes {stable_mosaic.version = 11 : i64} {
  func.func @_linear_kernel(%arg0: i32, %arg1: memref<8x784xf32, #tpu.memory_space<vmem>>, %arg2: memref<784x128xf32, #tpu.memory_space<vmem>>, %arg3: memref<1x128xf32, #tpu.memory_space<vmem>>, %arg4: memref<8x128xf32, #tpu.memory_space<vmem>>) attributes {dimension_semantics = [#tpu.dimension_semantics<parallel>], iteration_bounds = array<i64: 1>, scalar_prefetch = 0 : i64, scratch_operands = 0 : i64, tpu.core_type = #tpu.core_type<tc>, window_params = [{transform_indices = @transform_0, window_bounds = array<i64: 8, 784>}, {pipeline_mode = #tpu.pipeline_mode<synchronous>, transform_indices = @transform_1, window_bounds = array<i64: 784, 128>}, {pipeline_mode = #tpu.pipeline_mode<synchronous>, transform_indices = @transform_2, window_bounds = array<i64: 1, 128>}, {transform_indices = @transform_3, window_bounds = array<i64: 8, 128>}]} {
    %c0 = arith.constant 0 : index
    %c0_0 = arith.constant 0 : index
    %0 = vector.load %arg1[%c0, %c0_0] : memref<8x784xf32, #tpu.memory_space<vmem>>, vector<8x784xf32>
    %c0_1 = arith.constant 0 : index
    %c0_2 = arith.constant 0 : index
    %1 = vector.load %arg2[%c0_1, %c0_2] : memref<784x128xf32, #tpu.memory_space<vmem>>, vector<784x128xf32>
    %cst = arith.constant dense<0.000000e+00> : vector<8x128xf32>
    %2 = tpu.matmul %0, %1, %cst {dimension_numbers = #tpu.dot_dimension_numbers<[1], [0], [0], [1], [0, 0, 1, 1], [], []>} : vector<8x784xf32>, vector<784x128xf32>, vector<8x128xf32> -> vector<8x128xf32>
    %c0_3 = arith.constant 0 : index
    %c0_4 = arith.constant 0 : index
    %3 = vector.load %arg3[%c0_3, %c0_4] : memref<1x128xf32, #tpu.memory_space<vmem>>, vector<1x128xf32>
    %4 = vector.broadcast %3 : vector<1x128xf32> to vector<8x128xf32>
    %5 = arith.addf %2, %4 : vector<8x128xf32>
    %c0_5 = arith.constant 0 : index
    %c0_6 = arith.constant 0 : index
    %6 = vector.load %arg4[%c0_5, %c0_6] : memref<8x128xf32, #tpu.memory_space<vmem>>, vector<8x128xf32>
    tpu.vector_store %arg4[%c0_5, %c0_6], %5 {strides = array<i32>} : memref<8x128xf32, #tpu.memory_space<vmem>>, vector<8x128xf32>,
    return
  }
  func.func @transform_0(%arg0: i32) -> (i32, i32) {
    %c0_i32 = arith.constant 0 : i32
    %c0_i32_0 = arith.constant 0 : i32
    return %arg0, %c0_i32 : i32, i32
  }
  func.func @transform_1(%arg0: i32) -> (i32, i32) {
    %c0_i32 = arith.constant 0 : i32
    %c0_i32_0 = arith.constant 0 : i32
    %c0_i32_1 = arith.constant 0 : i32
    return %c0_i32, %c0_i32_0 : i32, i32
  }
  func.func @transform_2(%arg0: i32) -> (i32, i32) {
    %c0_i32 = arith.constant 0 : i32
    %c0_i32_0 = arith.constant 0 : i32
    %c0_i32_1 = arith.constant 0 : i32
    return %c0_i32, %c0_i32_0 : i32, i32
  }
  func.func @transform_3(%arg0: i32) -> (i32, i32) {
    %c0_i32 = arith.constant 0 : i32
    %c0_i32_0 = arith.constant 0 : i32
    return %arg0, %c0_i32 : i32, i32
  }
}

</mosaic_0001>

<bundles_post_ra>
// kernel: logreg_forward.1
= control target key start
LH: loop header
LB: loop body
LE: loop exit
PB: predicated region body
PF: predicated region fallthrough
CT: control target
= control target key end

     0   :  { %8 = vsyncpa [#allocation3], 0  ;;  %s320_s15 = smov [#allocation2]   ;;  %s321_s17 = smov 128   ;;  %s373_s0 = inlined_call_operand.vmem [shape: f32[8,784], index: 0, kind: input, shape index: {}]   ;;  %s374_s1 = inlined_call_operand.hbm [shape: f32[784,128], index: 1, kind: input, shape index: {}]   ;;  %s375_s2 = inlined_call_operand.vmem [shape: f32[1,128], index: 2, kind: input, shape index: {}]   ;;  %s376_s3 = inlined_call_operand.vmem [shape: f32[8,128], index: 3, kind: output, shape index: {}]  }
   0x1   :  { %s15_s14 = sshll.u32 %s374_s1, 4  ;;  %s17_s16 = sshll.u32 %s320_s15, 4  ;;  %s16_s14 = int_to_ptr.hbm [resolvable:$true] %s15_s14  ;;  %s18_s16 = int_to_ptr.vmem [resolvable:$true] %s17_s16 }
   0x2   :  { %s322_s18 = smov 8  }
   0x3   :  { %23 = dma.hbm_to_vmem [thread:$0]  %s16_s14, 12544, %s18_s16, [#allocation3], %s321_s17, %s321_s17, %s322_s18  }
   0x4   :  { %318 = dma.done.wait [#allocation3], 12544  }
   0x5   :  { %319 = vsyncadd [#allocation3], 4294954752  ;;  %v52_v0 = vld [vmem:[#allocation2 + $0x78] sm:$0xff]  ;;  %v51_v1 = vld [vmem:[#allocation2 + $0x70] sm:$0xff]  ;;  %vm139_vm0 = vcmask 130048  }
   0x6   :  { %v68_v2 = vld [vmem:[#allocation2 + $0xf8] sm:$0xff]  ;;  %143 = vmatpush.msra.mxu0 %v52_v0  ;;  %v67_v3 = vld [vmem:[#allocation2 + $0xf0] sm:$0xff]  ;;  %v50_v4 = vld [vmem:[#allocation2 + $0x68] sm:$0xff] }
   0x7   :  { %163 = vmatpush.msra.mxu1 %v68_v2  ;;  %v66_v5 = vld [vmem:[#allocation2 + $0xe8] sm:$0xff]  ;;  %v49_v6 = vld [vmem:[#allocation2 + $0x60] sm:$0xff]  ;;  %v48_v8 = vld [vmem:[#allocation2 + $0x58] sm:$0xff] }
   0x8   :  { %144 = vmatpush.msra.mxu0 %v51_v1  ;;  %v65_v7 = vld [vmem:[#allocation2 + $0xe0] sm:$0xff]  ;;  %v64_v9 = vld [vmem:[#allocation2 + $0xd8] sm:$0xff]  ;;  %v47_v10 = vld [vmem:[#allocation2 + $0x50] sm:$0xff] }
   0x9   :  { %164 = vmatpush.msra.mxu1 %v67_v3  ;;  %v84_v11 = vld [vmem:[#allocation2 + $0x178] sm:$0xff]  ;;  %v63_v12 = vld [vmem:[#allocation2 + $0xd0] sm:$0xff]  ;;  %v82_v15 = vld [vmem:[#allocation2 + $0x168] sm:$0xff] }
   0xa   :  { %145 = vmatpush.msra.mxu0 %v50_v4  ;;  %183 = vmatpush.msra.mxu2 %v84_v11  ;;  %v83_v13 = vld [vmem:[#allocation2 + $0x170] sm:$0xff]  ;;  %v100_v14 = vld [vmem:[#allocation2 + $0x1f8] sm:$0xff]  ;;  %v46_v17 = vld [vmem:[#allocation2 + $0x48] sm:$0xff] }
   0xb   :  { %165 = vmatpush.msra.mxu1 %v66_v5  ;;  %v99_v16 = vld [vmem:[#allocation2 + $0x1f0] sm:$0xff]  ;;  %v62_v18 = vld [vmem:[#allocation2 + $0xc8] sm:$0xff]  ;;  %203 = vmatpush.msra.mxu3 %v100_v14  ;;  %v81_v19 = vld [vmem:[#allocation2 + $0x160] sm:$0xff] }
   0xc   :  { %146 = vmatpush.msra.mxu0 %v49_v6  ;;  %184 = vmatpush.msra.mxu2 %v83_v13  ;;  %v98_v20 = vld [vmem:[#allocation2 + $0x1e8] sm:$0xff]  ;;  %v45_v21 = vld [vmem:[#allocation2 + $0x40] sm:$0xff]  ;;  %v80_v23 = vld [vmem:[#allocation2 + $0x158] sm:$0xff] }
   0xd   :  { %166 = vmatpush.msra.mxu1 %v65_v7  ;;  %v61_v22 = vld [vmem:[#allocation2 + $0xc0] sm:$0xff]  ;;  %204 = vmatpush.msra.mxu3 %v99_v16  ;;  %v44_v25 = vld [vmem:[#allocation2 + $0x38] sm:$0xff]  ;;  %v79_v27 = vld [vmem:[#allocation2 + $0x150] sm:$0xff] }
   0xe   :  { %147 = vmatpush.msra.mxu0 %v48_v8  ;;  %185 = vmatpush.msra.mxu2 %v82_v15  ;;  %v97_v24 = vld [vmem:[#allocation2 + $0x1e0] sm:$0xff]  ;;  %v60_v26 = vld [vmem:[#allocation2 + $0xb8] sm:$0xff]  ;;  %v43_v29 = vld [vmem:[#allocation2 + $0x30] sm:$0xff] }
   0xf   :  { %167 = vmatpush.msra.mxu1 %v64_v9  ;;  %205 = vmatpush.msra.mxu3 %v98_v20  ;;  %v96_v28 = vld [vmem:[#allocation2 + $0x1d8] sm:$0xff]  ;;  %v59_v30 = vld [vmem:[#allocation2 + $0xb0] sm:$0xff]  ;;  %v78_v31 = vld [vmem:[#allocation2 + $0x148] sm:$0xff] }
  0x10   :  { %148 = vmatpush.msra.mxu0 %v47_v10  ;;  %186 = vmatpush.msra.mxu2 %v81_v19  ;;  %v95_v32 = vld [vmem:[#allocation2 + $0x1d0] sm:$0xff]  ;;  %v42_v33 = vld [vmem:[#allocation2 + $0x28] sm:$0xff]  ;;  %v77_v35 = vld [vmem:[#allocation2 + $0x140] sm:$0xff] }
  0x11   :  { %168 = vmatpush.msra.mxu1 %v63_v12  ;;  %206 = vmatpush.msra.mxu3 %v97_v24  ;;  %v58_v34 = vld [vmem:[#allocation2 + $0xa8] sm:$0xff]  ;;  %v41_v37 = vld [vmem:[#allocation2 + $0x20] sm:$0xff]  ;;  %v76_v39 = vld [vmem:[#allocation2 + $0x138] sm:$0xff] }
  0x12   :  { %149 = vmatpush.msra.mxu0 %v46_v17  ;;  %187 = vmatpush.msra.mxu2 %v80_v23  ;;  %v94_v36 = vld [vmem:[#allocation2 + $0x1c8] sm:$0xff]  ;;  %v57_v38 = vld [vmem:[#allocation2 + $0xa0] sm:$0xff]  ;;  %v40_v41 = vld [vmem:[#allocation2 + $0x18] sm:$0xff] }
  0x13   :  { %169 = vmatpush.msra.mxu1 %v62_v18  ;;  %207 = vmatpush.msra.mxu3 %v96_v28  ;;  %v93_v40 = vld [vmem:[#allocation2 + $0x1c0] sm:$0xff]  ;;  %v56_v42 = vld [vmem:[#allocation2 + $0x98] sm:$0xff]  ;;  %v75_v43 = vld [vmem:[#allocation2 + $0x130] sm:$0xff] }
  0x14   :  { %150 = vmatpush.msra.mxu0 %v45_v21  ;;  %188 = vmatpush.msra.mxu2 %v79_v27  ;;  %v92_v44 = vld [vmem:[#allocation2 + $0x1b8] sm:$0xff]  ;;  %v39_v45 = vld [vmem:[#allocation2 + $0x10] sm:$0xff]  ;;  %v74_v47 = vld [vmem:[#allocation2 + $0x128] sm:$0xff] }
  0x15   :  { %170 = vmatpush.msra.mxu1 %v61_v22  ;;  %208 = vmatpush.msra.mxu3 %v95_v32  ;;  %v55_v46 = vld [vmem:[#allocation2 + $0x90] sm:$0xff]  ;;  %v38_v49 = vld [vmem:[#allocation2 + $0x8] sm:$0xff]  ;;  %v73_v51 = vld [vmem:[#allocation2 + $0x120] sm:$0xff] }
  0x16   :  { %151 = vmatpush.msra.mxu0 %v44_v25  ;;  %189 = vmatpush.msra.mxu2 %v78_v31  ;;  %v91_v48 = vld [vmem:[#allocation2 + $0x1b0] sm:$0xff]  ;;  %v54_v50 = vld [vmem:[#allocation2 + $0x88] sm:$0xff]  ;;  %v37_v53 = vld [vmem:[#allocation2] sm:$0xff] }
  0x17   :  { %171 = vmatpush.msra.mxu1 %v60_v26  ;;  %209 = vmatpush.msra.mxu3 %v94_v36  ;;  %v90_v52 = vld [vmem:[#allocation2 + $0x1a8] sm:$0xff]  ;;  %v53_v54 = vld [vmem:[#allocation2 + $0x80] sm:$0xff]  ;;  %v116_v55 = vld [vmem:[#allocation2 + $0x278] sm:$0xff] }
  0x18   :  { %152 = vmatpush.msra.mxu0 %v43_v29  ;;  %190 = vmatpush.msra.mxu2 %v77_v35  ;;  %v132_v56 = vld [vmem:[#allocation2 + $0x2f8] sm:$0xff]  ;;  %v89_v58 = vld [vmem:[#allocation2 + $0x1a0] sm:$0xff]  ;;  %v115_v59 = vld [vmem:[#allocation2 + $0x270] sm:$0xff] }
  0x19   :  { %172 = vmatpush.msra.mxu1 %v59_v30  ;;  %210 = vmatpush.msra.mxu3 %v93_v40  ;;  %v72_v57 = vld [vmem:[#allocation2 + $0x118] sm:$0xff]  ;;  %v131_v60 = vld [vmem:[#allocation2 + $0x2f0] sm:$0xff]  ;;  %v114_v63 = vld [vmem:[#allocation2 + $0x268] sm:$0xff] }
  0x1a   :  { %153 = vmatpush.msra.mxu0 %v42_v33  ;;  %191 = vmatpush.msra.mxu2 %v76_v39  ;;  %v71_v61 = vld [vmem:[#allocation2 + $0x110] sm:$0xff]  ;;  %v88_v62 = vld [vmem:[#allocation2 + $0x198] sm:$0xff]  ;;  %v130_v0 = vld [vmem:[#allocation2 + $0x2e8] sm:$0xff] }
  0x1b   :  { %173 = vmatpush.msra.mxu1 %v58_v34  ;;  %211 = vmatpush.msra.mxu3 %v92_v44  ;;  %v70_v1 = vld [vmem:[#allocation2 + $0x108] sm:$0xff]  ;;  %v87_v2 = vld [vmem:[#allocation2 + $0x190] sm:$0xff]  ;;  %v113_v3 = vld [vmem:[#allocation2 + $0x260] sm:$0xff] }
  0x1c   :  { %154 = vmatpush.msra.mxu0 %v41_v37  ;;  %192 = vmatpush.msra.mxu2 %v75_v43  ;;  %v129_v4 = vld [vmem:[#allocation2 + $0x2e0] sm:$0xff]  ;;  %v86_v6 = vld [vmem:[#allocation2 + $0x188] sm:$0xff]  ;;  %v112_v7 = vld [vmem:[#allocation2 + $0x258] sm:$0xff] }
  0x1d   :  { %174 = vmatpush.msra.mxu1 %v57_v38  ;;  %212 = vmatpush.msra.mxu3 %v91_v48  ;;  %v69_v5 = vld [vmem:[#allocation2 + $0x100] sm:$0xff]  ;;  %v128_v8 = vld [vmem:[#allocation2 + $0x2d8] sm:$0xff]  ;;  %v32_v9 = vld [vmem:[%s373_s0 + $0x10] sm:$0xff] }
  0x1e   :  { %155 = vmatpush.msra.mxu0 %v40_v41  ;;  %193 = vmatpush.msra.mxu2 %v74_v47  ;;  %v85_v10 = vld [vmem:[#allocation2 + $0x180] sm:$0xff]  ;;  %v111_v11 = vld [vmem:[#allocation2 + $0x250] sm:$0xff]  ;;  %v134_v13 = vld [vmem:[#allocation2 + $0x308] sm:$0xff] }
  0x1f   :  { %175 = vmatpush.msra.mxu1 %v56_v42  ;;  %213 = vmatpush.msra.mxu3 %v90_v52  ;;  %v127_v12 = vld [vmem:[#allocation2 + $0x2d0] sm:$0xff]  ;;  %v30_v14 = vld [vmem:[%s373_s0] sm:$0xff]  ;;  %v110_v15 = vld [vmem:[#allocation2 + $0x248] sm:$0xff] }
  0x20   :  { %156 = vmatpush.msra.mxu0 %v39_v45  ;;  %194 = vmatpush.msra.mxu2 %v73_v51  ;;  %v126_v16 = vld [vmem:[#allocation2 + $0x2c8] sm:$0xff]  ;;  %v33_v17 = vld [vmem:[%s373_s0 + $0x18] sm:$0xff]  ;;  %v109_v19 = vld [vmem:[#allocation2 + $0x240] sm:$0xff] }
  0x21   :  { %176 = vmatpush.msra.mxu1 %v55_v46  ;;  %214 = vmatpush.msra.mxu3 %v89_v58  ;;  %v31_v18 = vld [vmem:[%s373_s0 + $0x8] sm:$0xff]  ;;  %v125_v20 = vld [vmem:[#allocation2 + $0x2c0] sm:$0xff]  ;;  %v108_v22 = vld [vmem:[#allocation2 + $0x238] sm:$0xff] }
  0x22   :  { %157 = vmatpush.msra.mxu0 %v38_v49  ;;  %195 = vmatpush.msra.mxu2 %v72_v57  ;;  %v133_v21 = vld [vmem:[#allocation2 + $0x300] sm:$0xff]  ;;  %v124_v23 = vld [vmem:[#allocation2 + $0x2b8] sm:$0xff]  ;;  %v36_v24 = vld [vmem:[%s373_s0 + $0x30] sm:$0xff] }
  0x23   :  { %177 = vmatpush.msra.mxu1 %v54_v50  ;;  %215 = vmatpush.msra.mxu3 %v88_v62  ;;  %v107_v25 = vld [vmem:[#allocation2 + $0x230] sm:$0xff]  ;;  %v106_v27 = vld [vmem:[#allocation2 + $0x228] sm:$0xff]  ;;  %v105_v29 = vld [vmem:[#allocation2 + $0x220] sm:$0xff] }
  0x24   :  { %158 = vmatpush.msra.mxu0 %v37_v53  ;;  %196 = vmatpush.msra.mxu2 %v71_v61  ;;  %v123_v26 = vld [vmem:[#allocation2 + $0x2b0] sm:$0xff]  ;;  %v122_v28 = vld [vmem:[#allocation2 + $0x2a8] sm:$0xff]  ;;  %v121_v30 = vld [vmem:[#allocation2 + $0x2a0] sm:$0xff] }
  0x25   :  { %178 = vmatpush.msra.mxu1 %v53_v54  ;;  %216 = vmatpush.msra.mxu3 %v87_v2  ;;  %v104_v31 = vld [vmem:[#allocation2 + $0x218] sm:$0xff]  ;;  %v103_v33 = vld [vmem:[#allocation2 + $0x210] sm:$0xff]  ;;  %v102_v35 = vld [vmem:[#allocation2 + $0x208] sm:$0xff] }
  0x26   :  { %223 = vmatpush.msrb.mxu0 %v116_v55  ;;  %197 = vmatpush.msra.mxu2 %v70_v1  ;;  %v120_v32 = vld [vmem:[#allocation2 + $0x298] sm:$0xff]  ;;  %v119_v34 = vld [vmem:[#allocation2 + $0x290] sm:$0xff]  ;;  %v118_v36 = vld [vmem:[#allocation2 + $0x288] sm:$0xff] }
  0x27   :  { %243 = vmatpush.msrb.mxu1 %v132_v56  ;;  %217 = vmatpush.msra.mxu3 %v86_v6  ;;  %v101_v37 = vld [vmem:[#allocation2 + $0x200] sm:$0xff]  ;;  %v35_v40 = vld [vmem:[%s373_s0 + $0x28] sm:$0xff] }
  0x28   :  { %224 = vmatpush.msrb.mxu0 %v115_v59  ;;  %198 = vmatpush.msra.mxu2 %v69_v5  ;;  %v117_v38 = vld [vmem:[#allocation2 + $0x280] sm:$0xff] }
  0x29   :  { %244 = vmatpush.msrb.mxu1 %v131_v60  ;;  %199 = vmatmul.f32.vlgmr.msra.gmra.mxu2 %v32_v9  ;;  %v34_v39 = vld [vmem:[%s373_s0 + $0x20] sm:$0xff] }
  0x2a   :  { %225 = vmatpush.msrb.mxu0 %v114_v63  ;;  %218 = vmatpush.msra.mxu3 %v85_v10  ;;  %v293_v41 = vld [vmem:[%s375_s2] ss:$0 sm:$0xff] }
  0x2b   :  { %245 = vmatpush.msrb.mxu1 %v130_v0  ;;  %277 = vmatpush.msrb.mxu2 %v134_v13 }
  0x2c   :  { %226 = vmatpush.msrb.mxu0 %v113_v3  ;;  %219 = vmatmul.f32.vlgmr.msra.gmra.mxu3 %v33_v17 }
  0x2d   :  { %246 = vmatpush.msrb.mxu1 %v129_v4  ;;  %159 = vmatmul.f32.vlgmr.msra.gmra.mxu0 %v30_v14 }
  0x2e   :  { %227 = vmatpush.msrb.mxu0 %v112_v7  ;;  %179 = vmatmul.f32.vlgmr.msra.gmra.mxu1 %v31_v18 }
  0x2f   :  { %247 = vmatpush.msrb.mxu1 %v128_v8  ;;  %278 = vmatpush.msrb.mxu2 %v133_v21 }
  0x30   :  { %228 = vmatpush.msrb.mxu0 %v111_v11 }
  0x31   :  { %248 = vmatpush.msrb.mxu1 %v127_v12  ;;  %289 = vmatmul.msk.f32.vlgmr.msrb.gmra.mxu2 %vm139_vm0, %v36_v24 }
  0x32   :  { %229 = vmatpush.msrb.mxu0 %v110_v15 }
  0x33   :  { %249 = vmatpush.msrb.mxu1 %v126_v16 }
  0x34   :  { %230 = vmatpush.msrb.mxu0 %v109_v19 }
  0x35   :  { %250 = vmatpush.msrb.mxu1 %v125_v20 }
  0x36   :  { %231 = vmatpush.msrb.mxu0 %v108_v22 }
  0x37   :  { %251 = vmatpush.msrb.mxu1 %v124_v23 }
  0x38   :  { %232 = vmatpush.msrb.mxu0 %v107_v25 }
  0x39   :  { %252 = vmatpush.msrb.mxu1 %v123_v26 }
  0x3a   :  { %233 = vmatpush.msrb.mxu0 %v106_v27 }
  0x3b   :  { %253 = vmatpush.msrb.mxu1 %v122_v28 }
  0x3c   :  { %234 = vmatpush.msrb.mxu0 %v105_v29 }
  0x3d   :  { %254 = vmatpush.msrb.mxu1 %v121_v30 }
  0x3e   :  { %235 = vmatpush.msrb.mxu0 %v104_v31 }
  0x3f   :  { %255 = vmatpush.msrb.mxu1 %v120_v32 }
  0x40   :  { %236 = vmatpush.msrb.mxu0 %v103_v33 }
  0x41   :  { %256 = vmatpush.msrb.mxu1 %v119_v34 }
  0x42   :  { %237 = vmatpush.msrb.mxu0 %v102_v35 }
  0x43   :  { %257 = vmatpush.msrb.mxu1 %v118_v36 }
  0x44   :  { %238 = vmatpush.msrb.mxu0 %v101_v37 }
  0x45   :  { %258 = vmatpush.msrb.mxu1 %v117_v38  ;;  %239 = vmatmul.f32.vlgmr.msrb.gmra.mxu0 %v34_v39 }
  0x46   :  { %259 = vmatmul.f32.vlgmr.msrb.gmra.mxu1 %v35_v40 }
  0xaa   :  { %v160_v42 = vpop.f32.mrf.mxu0 }
  0xab   :  { %v161_v43 = vadd.f32 %v293_v41, %v160_v42  ;;  %v180_v44 = vpop.f32.mrf.mxu1 }
  0xac   :  { %v200_v46 = vpop.f32.mrf.mxu2 }
  0xad   :  { %v181_v45 = vadd.f32 %v180_v44, %v161_v43 }
  0xaf   :  { %v201_v47 = vadd.f32 %v200_v46, %v181_v45  ;;  %v220_v48 = vpop.f32.mrf.mxu3 }
  0xb1   :  { %v221_v49 = vadd.f32 %v220_v48, %v201_v47 }
  0xb4   :  { %v280_v53 = vpop.f32.mrf.mxu2 }
  0xc2   :  { %v240_v50 = vpop.f32.mrf.mxu0 }
  0xc3   :  { %v260_v51 = vpop.f32.mrf.mxu1  ;;  %v241_v52 = vadd.f32 %v240_v50, %v221_v49 }
  0xc5   :  { %v261_v54 = vadd.f32 %v260_v51, %v241_v52 }
  0xc7   :  { %v281_v55 = vadd.f32 %v280_v53, %v261_v54 }
  0xc9   :  { %283 = vst [vmem:[%s376_s3] sm:$0xff] %v281_v55 }
  0xca   :  { %288 = vsyncpa [#allocation3], 1 }

</bundles_post_ra>
